<compile_context>
chip_gen: v7x
topology: tpu7x:2x2x1
jax: 0.10.0
libtpu: 0.0.40
codegen_flags: <defaults>
</compile_context>

<pallas_src>
import math

import jax
import jax.numpy as jnp
from jax import lax
from jax.experimental import pallas as pl
from jax.experimental.pallas import tpu as pltpu


_LN_EPS = 1e-5  # torch.nn.LayerNorm default


def _layer_norm_f32(y, gamma, beta, eps=_LN_EPS):
    mean = jnp.mean(y, axis=-1, keepdims=True)
    ctr = y - mean
    var = jnp.mean(ctr * ctr, axis=-1, keepdims=True)
    return ctr * lax.rsqrt(var + eps) * gamma + beta


def _erf_f32(z):
    # Abramowitz & Stegun 7.1.26 polynomial erf approximation (|err| < 1.5e-7).
    # Only uses primitives guaranteed to lower in Mosaic (exp, mul/add, div, abs, where).
    a1, a2, a3, a4, a5 = (0.254829592, -0.284496736, 1.421413741,
                          -1.453152027, 1.061405429)
    p = 0.3275911
    sgn = jnp.where(z >= 0.0, 1.0, -1.0)
    za = jnp.abs(z)
    t = 1.0 / (1.0 + p * za)
    poly = ((((a5 * t + a4) * t + a3) * t + a2) * t + a1) * t
    return sgn * (1.0 - poly * jnp.exp(-za * za))


def _gelu_exact_f32(x):
    # PyTorch nn.GELU() (exact, erf-based) semantics.
    return 0.5 * x * (1.0 + _erf_f32(x * (1.0 / math.sqrt(2.0))))


def _default_vmem_limit_bytes():
    """Explicit scoped-VMEM budget: ~100 MiB on v5e/v6e (128 MiB physical),
    ~51 MiB ceiling on v7x (64 MiB physical)."""
    try:
        cap = int(pltpu.get_tpu_info().vmem_capacity_bytes)
    except Exception:
        cap = 64 * 1024 * 1024  # conservative fallback, safe on every generation
    return min(100 * 1024 * 1024, int(cap * 0.8))


def _make_res_post_block_kernel(num_heads, head_dim, compute_dtype, has_qkv_bias):
    C = num_heads * head_dim
    cdt = compute_dtype

    def kernel(*refs):
        if has_qkv_bias:
            (x_ref, wqkv_ref, bqkv_ref, wp_ref, bp_ref, g1_ref, b1_ref,
             wfc1_ref, bfc1_ref, wfc2_ref, bfc2_ref, g2_ref, b2_ref,
             o_ref) = refs
        else:
            (x_ref, wqkv_ref, wp_ref, bp_ref, g1_ref, b1_ref,
             wfc1_ref, bfc1_ref, wfc2_ref, bfc2_ref, g2_ref, b2_ref,
             o_ref) = refs
            bqkv_ref = None

        x = x_ref[0]                      # (N, C) f32 residual stream

        # ---- Attention: fused q/k/v projection = one wide MXU matmul.
        # Softmax scale (and q-bias scale) are pre-folded into the q columns
        # of wqkv in prepare_res_post_block_params().
        qkv_f32 = jnp.dot(x.astype(cdt), wqkv_ref[...],
                          preferred_element_type=jnp.float32)
        if has_qkv_bias:
            qkv_f32 = qkv_f32 + bqkv_ref[...]
        qkv = qkv_f32.astype(cdt)         # single cast; (N, 3C) lives in bf16

        # Per-head attention with the output projection folded in: each head's
        # context is immediately multiplied by its head_dim x C slab of W_proj
        # and accumulated into a lane-dense (N, C) f32 value. No ctx scratch,
        # no masked 64-lane stores.
        acc = None
        for h in range(num_heads):
            lo = h * head_dim
            hi = lo + head_dim
            qh = qkv[:, lo:hi]                     # scale already folded in
            kh = qkv[:, C + lo:C + hi]
            vh = qkv[:, 2 * C + lo:2 * C + hi]
            # q @ k.T without materializing a transpose.
            s = lax.dot_general(qh, kh, (((1,), (1,)), ((), ())),
                                preferred_element_type=jnp.float32)   # (N, N)
            s = s - jnp.max(s, axis=-1, keepdims=True)
            e = jnp.exp(s)
            p = e * pl.reciprocal(jnp.sum(e, axis=-1, keepdims=True), approx=True)
            ctx = jnp.dot(p.astype(cdt), vh,
                          preferred_element_type=jnp.float32)         # (N, D)
            contrib = jnp.dot(ctx.astype(cdt), wp_ref[lo:hi, :],
                              preferred_element_type=jnp.float32)     # (N, C)
            acc = contrib if acc is None else acc + contrib

        attn = acc + bp_ref[...]

        # ---- x = x + norm1(attn(x)) ----
        x1 = x + _layer_norm_f32(attn, g1_ref[...], b1_ref[...])

        # ---- MLP: fc1 -> GELU (exact) -> fc2 ----
        h1 = jnp.dot(x1.astype(cdt), wfc1_ref[...],
                     preferred_element_type=jnp.float32) + bfc1_ref[...]
        h1 = _gelu_exact_f32(h1).astype(cdt)       # keep (N, Hid) live in bf16
        m = jnp.dot(h1, wfc2_ref[...],
                    preferred_element_type=jnp.float32) + bfc2_ref[...]

        # ---- x = x + norm2(mlp(x)) ----
        o_ref[0] = (x1 + _layer_norm_f32(m, g2_ref[...], b2_ref[...])
                    ).astype(o_ref.dtype)

    return kernel


def prepare_res_post_block_params(params, *, num_heads, compute_dtype=jnp.bfloat16):
    """One-time weight prep (hoist out of the per-call path; do it at model load
    or under the surrounding jit so it constant-folds).

    params (PyTorch nn.Linear convention W:(out,in)):
      wq, wk, wv, wp : (C, C)     bqkv : (3C,) or None     bp : (C,)
      g1, b1, g2, b2 : (C,)       (LayerNorm affine params)
      wfc1 : (Hid, C)  bfc1 : (Hid,)   wfc2 : (C, Hid)  bfc2 : (C,)
    """
    C = params["wp"].shape[0]
    assert C % num_heads == 0, "dim should be divisible by num_heads"
    head_dim = C // num_heads
    scale = head_dim ** (-0.5)
    cdt = compute_dtype

    # Fuse q/k/v into one pre-transposed (C, 3C) weight; fold the softmax scale
    # into the q columns (weight-side, one-time op). All weights pre-transposed
    # to (in, out) so the kernel never transposes.
    w_qkv = jnp.concatenate(
        [params["wq"].T * scale, params["wk"].T, params["wv"].T],
        axis=1).astype(cdt)

    bqkv = params.get("bqkv")
    if bqkv is not None:
        bq, bk, bv = jnp.split(bqkv.astype(jnp.float32), 3)
        b_qkv = jnp.concatenate([bq * scale, bk, bv]).reshape(1, 3 * C)
    else:
        b_qkv = None  # compile-time skip of the bias add

    row = lambda a: a.reshape(1, -1).astype(jnp.float32)
    return dict(
        num_heads=num_heads,
        head_dim=head_dim,
        compute_dtype=cdt,
        w_qkv=w_qkv,
        b_qkv=b_qkv,
        wp_t=params["wp"].T.astype(cdt),
        bp=row(params["bp"]),
        g1=row(params["g1"]), b1=row(params["b1"]),
        wfc1_t=params["wfc1"].T.astype(cdt),
        bfc1=row(params["bfc1"]),
        wfc2_t=params["wfc2"].T.astype(cdt),
        bfc2=row(params["bfc2"]),
        g2=row(params["g2"]), b2=row(params["b2"]),
    )


def res_post_block_pallas(x, prepped):
    """Full ResPostBlock forward. x: (B, N, C) float32; prepped from
    prepare_res_post_block_params()."""
    B, N, C = x.shape
    num_heads = prepped["num_heads"]
    head_dim = prepped["head_dim"]
    cdt = prepped["compute_dtype"]
    has_qkv_bias = prepped["b_qkv"] is not None
    Hid = prepped["wfc1_t"].shape[1]
    assert num_heads * head_dim == C

    kernel = _make_res_post_block_kernel(num_heads, head_dim, cdt, has_qkv_bias)

    def invariant_spec(arr):
        # Grid-invariant operand: full-array block, single-buffered so it is
        # resident in VMEM exactly once (no useless double-buffering of weights).
        nd = arr.ndim
        return pl.BlockSpec(arr.shape, lambda b, _nd=nd: (0,) * _nd,
                            pipeline_mode=pl.Buffered(1))

    weight_args = [prepped["w_qkv"]]
    if has_qkv_bias:
        weight_args.append(prepped["b_qkv"])
    weight_args += [
        prepped["wp_t"], prepped["bp"],
        prepped["g1"], prepped["b1"],
        prepped["wfc1_t"], prepped["bfc1"],
        prepped["wfc2_t"], prepped["bfc2"],
        prepped["g2"], prepped["b2"],
    ]

    in_specs = [pl.BlockSpec((1, N, C), lambda b: (b, 0, 0))]
    in_specs += [invariant_spec(a) for a in weight_args]

    flops = int(2 * B * N * C * 3 * C        # fused qkv projection
                + 4 * B * N * N * C          # scores + attn @ v
                + 2 * B * N * C * C          # folded output projection
                + 4 * B * N * C * Hid        # mlp
                + 20 * B * N * C)            # softmax / layernorm / residuals
    transcendentals = int(B * num_heads * N * N + B * N * Hid + 4 * B * N)
    wbytes = sum(int(a.size) * a.dtype.itemsize for a in weight_args)
    bytes_accessed = int(2 * x.size * x.dtype.itemsize + wbytes)

    return pl.pallas_call(
        kernel,
        out_shape=jax.ShapeDtypeStruct((B, N, C), x.dtype),
        grid_spec=pltpu.PrefetchScalarGridSpec(
            num_scalar_prefetch=0,
            grid=(B,),
            in_specs=in_specs,
            out_specs=pl.BlockSpec((1, N, C), lambda b: (b, 0, 0)),
        ),
        compiler_params=pltpu.CompilerParams(
            dimension_semantics=("parallel",),
            vmem_limit_bytes=_default_vmem_limit_bytes(),
        ),
        cost_estimate=pl.CostEstimate(
            flops=flops, transcendentals=transcendentals,
            bytes_accessed=bytes_accessed),
    )(x, *weight_args)


def res_post_block_reference(x, params, *, num_heads, matmul_dtype=jnp.float32):
    """Pure-JAX reference reproducing the PyTorch ResPostBlock forward."""
    B, N, C = x.shape
    D = C // num_heads
    scale = D ** (-0.5)
    md = matmul_dtype

    def dense(a, w, b=None):
        y = jnp.einsum("bnc,oc->bno", a.astype(md), w.astype(md),
                       preferred_element_type=jnp.float32)
        return y if b is None else y + b

    bq = bk = bv = None
    if params.get("bqkv") is not None:
        bq, bk, bv = jnp.split(params["bqkv"], 3)

    def heads(y):
        return y.reshape(B, N, num_heads, D).transpose(0, 2, 1, 3)

    def attention(a):
        q = heads(dense(a, params["wq"], bq))
        k = heads(dense(a, params["wk"], bk))
        v = heads(dense(a, params["wv"], bv))
        s = jnp.einsum("bhnd,bhmd->bhnm", (q * scale).astype(md), k.astype(md),
                       preferred_element_type=jnp.float32)
        p = jax.nn.softmax(s, axis=-1)
        ctx = jnp.einsum("bhnm,bhmd->bhnd", p.astype(md), v.astype(md),
                         preferred_element_type=jnp.float32)
        ctx = ctx.transpose(0, 2, 1, 3).reshape(B, N, C)
        return dense(ctx, params["wp"], params["bp"])

    def layer_norm(y, g, b):
        mean = jnp.mean(y, axis=-1, keepdims=True)
        var = jnp.mean(jnp.square(y - mean), axis=-1, keepdims=True)
        return (y - mean) * lax.rsqrt(var + _LN_EPS) * g + b

    def mlp(a):
        h = dense(a, params["wfc1"], params["bfc1"])
        h = jax.nn.gelu(h, approximate=False)     # PyTorch nn.GELU() (exact erf)
        return dense(h, params["wfc2"], params["bfc2"])

    out = x + layer_norm(attention(x), params["g1"], params["b1"])
    out = out + layer_norm(mlp(out), params["g2"], params["b2"])
    return out


if __name__ == "__main__":
    # Small shapes consistent with the module: x (B, N, C), num_heads | C,
    # mlp hidden = 4 * C.
    B, N, C = 2, 8, 32
    num_heads = 4
    hidden = int(C * 4.0)

    key = jax.random.PRNGKey(0)
    keys = jax.random.split(key, 12)

    x = jax.random.normal(keys[0], (B, N, C), jnp.float32)
    params = dict(
        wq=0.02 * jax.random.normal(keys[1], (C, C), jnp.float32),
        wk=0.02 * jax.random.normal(keys[2], (C, C), jnp.float32),
        wv=0.02 * jax.random.normal(keys[3], (C, C), jnp.float32),
        bqkv=None,                                    # qkv_bias=False (module default)
        wp=0.02 * jax.random.normal(keys[4], (C, C), jnp.float32),
        bp=0.02 * jax.random.normal(keys[5], (C,), jnp.float32),
        g1=1.0 + 0.05 * jax.random.normal(keys[6], (C,), jnp.float32),
        b1=0.02 * jax.random.normal(keys[7], (C,), jnp.float32),
        wfc1=0.02 * jax.random.normal(keys[8], (hidden, C), jnp.float32),
        bfc1=0.02 * jax.random.normal(keys[9], (hidden,), jnp.float32),
        wfc2=0.02 * jax.random.normal(keys[10], (C, hidden), jnp.float32),
        bfc2=0.02 * jax.random.normal(keys[11], (C,), jnp.float32),
        g2=jnp.ones((C,), jnp.float32),               # LayerNorm defaults (init_values=None)
        b2=jnp.zeros((C,), jnp.float32),
    )

    # One-time weight prep (hoisted out of the per-call path).
    prepped = prepare_res_post_block_params(params, num_heads=num_heads,
                                            compute_dtype=jnp.bfloat16)

    out = res_post_block_pallas(x, prepped)
    out = jax.block_until_ready(out)
    assert out.shape == (B, N, C)

    # 1) Module-semantics reference (f32 matmuls, exact erf GELU). Tolerance is
    #    loose because the kernel runs its matmuls with bf16 operands
    #    (f32 accumulation), and the two post-norm LayerNorms amplify that noise.
    ref_f32 = res_post_block_reference(x, params, num_heads=num_heads,
                                       matmul_dtype=jnp.float32)
    assert jnp.allclose(out, ref_f32, atol=5e-2, rtol=5e-2), \
        "mismatch vs f32 module reference"

    # 2) Structural check: same bf16-operand / f32-accumulate recipe in plain XLA.
    ref_bf16 = res_post_block_reference(x, params, num_heads=num_heads,
                                        matmul_dtype=jnp.bfloat16)
    assert jnp.allclose(out, ref_bf16, atol=2e-2, rtol=2e-2), \
        "mismatch vs bf16 structural reference"

    print("KERNEL_OK")
</pallas_src>

<mosaic_0001>
module attributes {stable_mosaic.version = 11 : i64} {
  func.func @kernel(%arg0: i32, %arg1: memref<1x8x32xf32, #tpu.memory_space<vmem>>, %arg2: memref<32x96xbf16, #tpu.memory_space<vmem>>, %arg3: memref<32x32xbf16, #tpu.memory_space<vmem>>, %arg4: memref<1x32xf32, #tpu.memory_space<vmem>>, %arg5: memref<1x32xf32, #tpu.memory_space<vmem>>, %arg6: memref<1x32xf32, #tpu.memory_space<vmem>>, %arg7: memref<32x128xbf16, #tpu.memory_space<vmem>>, %arg8: memref<1x128xf32, #tpu.memory_space<vmem>>, %arg9: memref<128x32xbf16, #tpu.memory_space<vmem>>, %arg10: memref<1x32xf32, #tpu.memory_space<vmem>>, %arg11: memref<1x32xf32, #tpu.memory_space<vmem>>, %arg12: memref<1x32xf32, #tpu.memory_space<vmem>>, %arg13: memref<1x8x32xf32, #tpu.memory_space<vmem>>) attributes {dimension_semantics = [#tpu.dimension_semantics<parallel>], iteration_bounds = array<i64: 2>, scalar_prefetch = 0 : i64, scratch_operands = 0 : i64, tpu.core_type = #tpu.core_type<tc>, window_params = [{transform_indices = @transform_0, window_bounds = array<i64: 1, 8, 32>}, {pipeline_mode = #tpu.pipeline_mode<synchronous>, transform_indices = @transform_1, window_bounds = array<i64: 32, 96>}, {pipeline_mode = #tpu.pipeline_mode<synchronous>, transform_indices = @transform_2, window_bounds = array<i64: 32, 32>}, {pipeline_mode = #tpu.pipeline_mode<synchronous>, transform_indices = @transform_3, window_bounds = array<i64: 1, 32>}, {pipeline_mode = #tpu.pipeline_mode<synchronous>, transform_indices = @transform_4, window_bounds = array<i64: 1, 32>}, {pipeline_mode = #tpu.pipeline_mode<synchronous>, transform_indices = @transform_5, window_bounds = array<i64: 1, 32>}, {pipeline_mode = #tpu.pipeline_mode<synchronous>, transform_indices = @transform_6, window_bounds = array<i64: 32, 128>}, {pipeline_mode = #tpu.pipeline_mode<synchronous>, transform_indices = @transform_7, window_bounds = array<i64: 1, 128>}, {pipeline_mode = #tpu.pipeline_mode<synchronous>, transform_indices = @transform_8, window_bounds = array<i64: 128, 32>}, {pipeline_mode = #tpu.pipeline_mode<synchronous>, transform_indices = @transform_9, window_bounds = array<i64: 1, 32>}, {pipeline_mode = #tpu.pipeline_mode<synchronous>, transform_indices = @transform_10, window_bounds = array<i64: 1, 32>}, {pipeline_mode = #tpu.pipeline_mode<synchronous>, transform_indices = @transform_11, window_bounds = array<i64: 1, 32>}, {transform_indices = @transform_12, window_bounds = array<i64: 1, 8, 32>}]} {
    %c0 = arith.constant 0 : index
    %c0_0 = arith.constant 0 : index
    %c0_1 = arith.constant 0 : index
    %0 = vector.load %arg1[%c0, %c0_0, %c0_1] : memref<1x8x32xf32, #tpu.memory_space<vmem>>, vector<1x8x32xf32>
    %1 = vector.shape_cast %0 : vector<1x8x32xf32> to vector<8x32xf32>
    %2 = arith.truncf %1 : vector<8x32xf32> to vector<8x32xbf16>
    %c0_2 = arith.constant 0 : index
    %c0_3 = arith.constant 0 : index
    %3 = vector.load %arg2[%c0_2, %c0_3] : memref<32x96xbf16, #tpu.memory_space<vmem>>, vector<32x96xbf16>
    %cst = arith.constant dense<0.000000e+00> : vector<8x96xf32>
    %4 = tpu.matmul %2, %3, %cst {dimension_numbers = #tpu.dot_dimension_numbers<[1], [0], [0], [1], [0, 0, 1, 1], [], []>} : vector<8x32xbf16>, vector<32x96xbf16>, vector<8x96xf32> -> vector<8x96xf32>
    %5 = arith.truncf %4 : vector<8x96xf32> to vector<8x96xbf16>
    %6 = vector.extract_strided_slice %5 {offsets = [0, 0], sizes = [8, 8], strides = [1, 1]} : vector<8x96xbf16> to vector<8x8xbf16>
    %7 = vector.extract_strided_slice %5 {offsets = [0, 32], sizes = [8, 8], strides = [1, 1]} : vector<8x96xbf16> to vector<8x8xbf16>
    %8 = vector.extract_strided_slice %5 {offsets = [0, 64], sizes = [8, 8], strides = [1, 1]} : vector<8x96xbf16> to vector<8x8xbf16>
    %cst_4 = arith.constant dense<0.000000e+00> : vector<8x8xf32>
    %9 = tpu.matmul %6, %7, %cst_4 {dimension_numbers = #tpu.dot_dimension_numbers<[1], [1], [0], [0], [0, 0, 1, 0], [], []>} : vector<8x8xbf16>, vector<8x8xbf16>, vector<8x8xf32> -> vector<8x8xf32>
    %cst_5 = arith.constant dense<0xFF800000> : vector<8xf32>
    %10 = vector.multi_reduction <maximumf>, %9, %cst_5 [1] : vector<8x8xf32> to vector<8xf32>
    %11 = vector.shape_cast %10 : vector<8xf32> to vector<8x1xf32>
    %12 = vector.broadcast %11 : vector<8x1xf32> to vector<8x8xf32>
    %13 = arith.subf %9, %12 : vector<8x8xf32>
    %14 = math.exp %13 : vector<8x8xf32>
    %cst_6 = arith.constant dense<0.000000e+00> : vector<8xf32>
    %15 = vector.multi_reduction <add>, %14, %cst_6 [1] : vector<8x8xf32> to vector<8xf32>
    %16 = vector.shape_cast %15 : vector<8xf32> to vector<8x1xf32>
    %17 = tpu.reciprocal %16 {approx = true} : vector<8x1xf32> -> vector<8x1xf32>
    %18 = vector.broadcast %17 : vector<8x1xf32> to vector<8x8xf32>
    %19 = arith.mulf %14, %18 : vector<8x8xf32>
    %20 = arith.truncf %19 : vector<8x8xf32> to vector<8x8xbf16>
    %cst_7 = arith.constant dense<0.000000e+00> : vector<8x8xf32>
    %21 = tpu.matmul %20, %8, %cst_7 {dimension_numbers = #tpu.dot_dimension_numbers<[1], [0], [0], [1], [0, 0, 1, 1], [], []>} : vector<8x8xbf16>, vector<8x8xbf16>, vector<8x8xf32> -> vector<8x8xf32>
    %22 = arith.truncf %21 : vector<8x8xf32> to vector<8x8xbf16>
    %c0_8 = arith.constant 0 : index
    %c0_9 = arith.constant 0 : index
    %23 = vector.load %arg3[%c0_8, %c0_9] : memref<32x32xbf16, #tpu.memory_space<vmem>>, vector<8x32xbf16>
    %cst_10 = arith.constant dense<0.000000e+00> : vector<8x32xf32>
    %24 = tpu.matmul %22, %23, %cst_10 {dimension_numbers = #tpu.dot_dimension_numbers<[1], [0], [0], [1], [0, 0, 1, 1], [], []>} : vector<8x8xbf16>, vector<8x32xbf16>, vector<8x32xf32> -> vector<8x32xf32>
    %25 = vector.extract_strided_slice %5 {offsets = [0, 8], sizes = [8, 8], strides = [1, 1]} : vector<8x96xbf16> to vector<8x8xbf16>
    %26 = vector.extract_strided_slice %5 {offsets = [0, 40], sizes = [8, 8], strides = [1, 1]} : vector<8x96xbf16> to vector<8x8xbf16>
    %27 = vector.extract_strided_slice %5 {offsets = [0, 72], sizes = [8, 8], strides = [1, 1]} : vector<8x96xbf16> to vector<8x8xbf16>
    %cst_11 = arith.constant dense<0.000000e+00> : vector<8x8xf32>
    %28 = tpu.matmul %25, %26, %cst_11 {dimension_numbers = #tpu.dot_dimension_numbers<[1], [1], [0], [0], [0, 0, 1, 0], [], []>} : vector<8x8xbf16>, vector<8x8xbf16>, vector<8x8xf32> -> vector<8x8xf32>
    %cst_12 = arith.constant dense<0xFF800000> : vector<8xf32>
    %29 = vector.multi_reduction <maximumf>, %28, %cst_12 [1] : vector<8x8xf32> to vector<8xf32>
    %30 = vector.shape_cast %29 : vector<8xf32> to vector<8x1xf32>
    %31 = vector.broadcast %30 : vector<8x1xf32> to vector<8x8xf32>
    %32 = arith.subf %28, %31 : vector<8x8xf32>
    %33 = math.exp %32 : vector<8x8xf32>
    %cst_13 = arith.constant dense<0.000000e+00> : vector<8xf32>
    %34 = vector.multi_reduction <add>, %33, %cst_13 [1] : vector<8x8xf32> to vector<8xf32>
    %35 = vector.shape_cast %34 : vector<8xf32> to vector<8x1xf32>
    %36 = tpu.reciprocal %35 {approx = true} : vector<8x1xf32> -> vector<8x1xf32>
    %37 = vector.broadcast %36 : vector<8x1xf32> to vector<8x8xf32>
    %38 = arith.mulf %33, %37 : vector<8x8xf32>
    %39 = arith.truncf %38 : vector<8x8xf32> to vector<8x8xbf16>
    %cst_14 = arith.constant dense<0.000000e+00> : vector<8x8xf32>
    %40 = tpu.matmul %39, %27, %cst_14 {dimension_numbers = #tpu.dot_dimension_numbers<[1], [0], [0], [1], [0, 0, 1, 1], [], []>} : vector<8x8xbf16>, vector<8x8xbf16>, vector<8x8xf32> -> vector<8x8xf32>
    %41 = arith.truncf %40 : vector<8x8xf32> to vector<8x8xbf16>
    %c8 = arith.constant 8 : index
    %c0_15 = arith.constant 0 : index
    %42 = vector.load %arg3[%c8, %c0_15] : memref<32x32xbf16, #tpu.memory_space<vmem>>, vector<8x32xbf16>
    %cst_16 = arith.constant dense<0.000000e+00> : vector<8x32xf32>
    %43 = tpu.matmul %41, %42, %cst_16 {dimension_numbers = #tpu.dot_dimension_numbers<[1], [0], [0], [1], [0, 0, 1, 1], [], []>} : vector<8x8xbf16>, vector<8x32xbf16>, vector<8x32xf32> -> vector<8x32xf32>
    %44 = arith.addf %24, %43 : vector<8x32xf32>
    %45 = vector.extract_strided_slice %5 {offsets = [0, 16], sizes = [8, 8], strides = [1, 1]} : vector<8x96xbf16> to vector<8x8xbf16>
    %46 = vector.extract_strided_slice %5 {offsets = [0, 48], sizes = [8, 8], strides = [1, 1]} : vector<8x96xbf16> to vector<8x8xbf16>
    %47 = vector.extract_strided_slice %5 {offsets = [0, 80], sizes = [8, 8], strides = [1, 1]} : vector<8x96xbf16> to vector<8x8xbf16>
    %cst_17 = arith.constant dense<0.000000e+00> : vector<8x8xf32>
    %48 = tpu.matmul %45, %46, %cst_17 {dimension_numbers = #tpu.dot_dimension_numbers<[1], [1], [0], [0], [0, 0, 1, 0], [], []>} : vector<8x8xbf16>, vector<8x8xbf16>, vector<8x8xf32> -> vector<8x8xf32>
    %cst_18 = arith.constant dense<0xFF800000> : vector<8xf32>
    %49 = vector.multi_reduction <maximumf>, %48, %cst_18 [1] : vector<8x8xf32> to vector<8xf32>
    %50 = vector.shape_cast %49 : vector<8xf32> to vector<8x1xf32>
    %51 = vector.broadcast %50 : vector<8x1xf32> to vector<8x8xf32>
    %52 = arith.subf %48, %51 : vector<8x8xf32>
    %53 = math.exp %52 : vector<8x8xf32>
    %cst_19 = arith.constant dense<0.000000e+00> : vector<8xf32>
    %54 = vector.multi_reduction <add>, %53, %cst_19 [1] : vector<8x8xf32> to vector<8xf32>
    %55 = vector.shape_cast %54 : vector<8xf32> to vector<8x1xf32>
    %56 = tpu.reciprocal %55 {approx = true} : vector<8x1xf32> -> vector<8x1xf32>
    %57 = vector.broadcast %56 : vector<8x1xf32> to vector<8x8xf32>
    %58 = arith.mulf %53, %57 : vector<8x8xf32>
    %59 = arith.truncf %58 : vector<8x8xf32> to vector<8x8xbf16>
    %cst_20 = arith.constant dense<0.000000e+00> : vector<8x8xf32>
    %60 = tpu.matmul %59, %47, %cst_20 {dimension_numbers = #tpu.dot_dimension_numbers<[1], [0], [0], [1], [0, 0, 1, 1], [], []>} : vector<8x8xbf16>, vector<8x8xbf16>, vector<8x8xf32> -> vector<8x8xf32>
    %61 = arith.truncf %60 : vector<8x8xf32> to vector<8x8xbf16>
    %c16 = arith.constant 16 : index
    %c0_21 = arith.constant 0 : index
    %62 = vector.load %arg3[%c16, %c0_21] : memref<32x32xbf16, #tpu.memory_space<vmem>>, vector<8x32xbf16>
    %cst_22 = arith.constant dense<0.000000e+00> : vector<8x32xf32>
    %63 = tpu.matmul %61, %62, %cst_22 {dimension_numbers = #tpu.dot_dimension_numbers<[1], [0], [0], [1], [0, 0, 1, 1], [], []>} : vector<8x8xbf16>, vector<8x32xbf16>, vector<8x32xf32> -> vector<8x32xf32>
    %64 = arith.addf %44, %63 : vector<8x32xf32>
    %65 = vector.extract_strided_slice %5 {offsets = [0, 24], sizes = [8, 8], strides = [1, 1]} : vector<8x96xbf16> to vector<8x8xbf16>
    %66 = vector.extract_strided_slice %5 {offsets = [0, 56], sizes = [8, 8], strides = [1, 1]} : vector<8x96xbf16> to vector<8x8xbf16>
    %67 = vector.extract_strided_slice %5 {offsets = [0, 88], sizes = [8, 8], strides = [1, 1]} : vector<8x96xbf16> to vector<8x8xbf16>
    %cst_23 = arith.constant dense<0.000000e+00> : vector<8x8xf32>
    %68 = tpu.matmul %65, %66, %cst_23 {dimension_numbers = #tpu.dot_dimension_numbers<[1], [1], [0], [0], [0, 0, 1, 0], [], []>} : vector<8x8xbf16>, vector<8x8xbf16>, vector<8x8xf32> -> vector<8x8xf32>
    %cst_24 = arith.constant dense<0xFF800000> : vector<8xf32>
    %69 = vector.multi_reduction <maximumf>, %68, %cst_24 [1] : vector<8x8xf32> to vector<8xf32>
    %70 = vector.shape_cast %69 : vector<8xf32> to vector<8x1xf32>
    %71 = vector.broadcast %70 : vector<8x1xf32> to vector<8x8xf32>
    %72 = arith.subf %68, %71 : vector<8x8xf32>
    %73 = math.exp %72 : vector<8x8xf32>
    %cst_25 = arith.constant dense<0.000000e+00> : vector<8xf32>
    %74 = vector.multi_reduction <add>, %73, %cst_25 [1] : vector<8x8xf32> to vector<8xf32>
    %75 = vector.shape_cast %74 : vector<8xf32> to vector<8x1xf32>
    %76 = tpu.reciprocal %75 {approx = true} : vector<8x1xf32> -> vector<8x1xf32>
    %77 = vector.broadcast %76 : vector<8x1xf32> to vector<8x8xf32>
    %78 = arith.mulf %73, %77 : vector<8x8xf32>
    %79 = arith.truncf %78 : vector<8x8xf32> to vector<8x8xbf16>
    %cst_26 = arith.constant dense<0.000000e+00> : vector<8x8xf32>
    %80 = tpu.matmul %79, %67, %cst_26 {dimension_numbers = #tpu.dot_dimension_numbers<[1], [0], [0], [1], [0, 0, 1, 1], [], []>} : vector<8x8xbf16>, vector<8x8xbf16>, vector<8x8xf32> -> vector<8x8xf32>
    %81 = arith.truncf %80 : vector<8x8xf32> to vector<8x8xbf16>
    %c24 = arith.constant 24 : index
    %c0_27 = arith.constant 0 : index
    %82 = vector.load %arg3[%c24, %c0_27] : memref<32x32xbf16, #tpu.memory_space<vmem>>, vector<8x32xbf16>
    %cst_28 = arith.constant dense<0.000000e+00> : vector<8x32xf32>
    %83 = tpu.matmul %81, %82, %cst_28 {dimension_numbers = #tpu.dot_dimension_numbers<[1], [0], [0], [1], [0, 0, 1, 1], [], []>} : vector<8x8xbf16>, vector<8x32xbf16>, vector<8x32xf32> -> vector<8x32xf32>
    %84 = arith.addf %64, %83 : vector<8x32xf32>
    %c0_29 = arith.constant 0 : index
    %c0_30 = arith.constant 0 : index
    %85 = vector.load %arg4[%c0_29, %c0_30] : memref<1x32xf32, #tpu.memory_space<vmem>>, vector<1x32xf32>
    %86 = vector.broadcast %85 : vector<1x32xf32> to vector<8x32xf32>
    %87 = arith.addf %84, %86 : vector<8x32xf32>
    %c0_31 = arith.constant 0 : index
    %c0_32 = arith.constant 0 : index
    %88 = vector.load %arg5[%c0_31, %c0_32] : memref<1x32xf32, #tpu.memory_space<vmem>>, vector<1x32xf32>
    %c0_33 = arith.constant 0 : index
    %c0_34 = arith.constant 0 : index
    %89 = vector.load %arg6[%c0_33, %c0_34] : memref<1x32xf32, #tpu.memory_space<vmem>>, vector<1x32xf32>
    %cst_35 = arith.constant dense<0.000000e+00> : vector<8xf32>
    %90 = vector.multi_reduction <add>, %87, %cst_35 [1] : vector<8x32xf32> to vector<8xf32>
    %91 = vector.shape_cast %90 : vector<8xf32> to vector<8x1xf32>
    %cst_36 = arith.constant 3.200000e+01 : f32
    %92 = vector.broadcast %cst_36 : f32 to vector<8x1xf32>
    %93 = arith.divf %91, %92 : vector<8x1xf32>
    %94 = vector.broadcast %93 : vector<8x1xf32> to vector<8x32xf32>
    %95 = arith.subf %87, %94 : vector<8x32xf32>
    %96 = arith.mulf %95, %95 : vector<8x32xf32>
    %cst_37 = arith.constant dense<0.000000e+00> : vector<8xf32>
    %97 = vector.multi_reduction <add>, %96, %cst_37 [1] : vector<8x32xf32> to vector<8xf32>
    %98 = vector.shape_cast %97 : vector<8xf32> to vector<8x1xf32>
    %cst_38 = arith.constant 3.200000e+01 : f32
    %99 = vector.broadcast %cst_38 : f32 to vector<8x1xf32>
    %100 = arith.divf %98, %99 : vector<8x1xf32>
    %cst_39 = arith.constant 9.99999974E-6 : f32
    %101 = vector.broadcast %cst_39 : f32 to vector<8x1xf32>
    %102 = arith.addf %100, %101 : vector<8x1xf32>
    %103 = math.rsqrt %102 : vector<8x1xf32>
    %104 = vector.broadcast %103 : vector<8x1xf32> to vector<8x32xf32>
    %105 = arith.mulf %95, %104 : vector<8x32xf32>
    %106 = vector.broadcast %88 : vector<1x32xf32> to vector<8x32xf32>
    %107 = arith.mulf %105, %106 : vector<8x32xf32>
    %108 = vector.broadcast %89 : vector<1x32xf32> to vector<8x32xf32>
    %109 = arith.addf %107, %108 : vector<8x32xf32>
    %110 = arith.addf %1, %109 : vector<8x32xf32>
    %111 = arith.truncf %110 : vector<8x32xf32> to vector<8x32xbf16>
    %c0_40 = arith.constant 0 : index
    %c0_41 = arith.constant 0 : index
    %112 = vector.load %arg7[%c0_40, %c0_41] : memref<32x128xbf16, #tpu.memory_space<vmem>>, vector<32x128xbf16>
    %cst_42 = arith.constant dense<0.000000e+00> : vector<8x128xf32>
    %113 = tpu.matmul %111, %112, %cst_42 {dimension_numbers = #tpu.dot_dimension_numbers<[1], [0], [0], [1], [0, 0, 1, 1], [], []>} : vector<8x32xbf16>, vector<32x128xbf16>, vector<8x128xf32> -> vector<8x128xf32>
    %c0_43 = arith.constant 0 : index
    %c0_44 = arith.constant 0 : index
    %114 = vector.load %arg8[%c0_43, %c0_44] : memref<1x128xf32, #tpu.memory_space<vmem>>, vector<1x128xf32>
    %115 = vector.broadcast %114 : vector<1x128xf32> to vector<8x128xf32>
    %116 = arith.addf %113, %115 : vector<8x128xf32>
    %cst_45 = arith.constant 5.000000e-01 : f32
    %117 = vector.broadcast %cst_45 : f32 to vector<8x128xf32>
    %118 = arith.mulf %117, %116 : vector<8x128xf32>
    %cst_46 = arith.constant 0.707106769 : f32
    %119 = vector.broadcast %cst_46 : f32 to vector<8x128xf32>
    %120 = arith.mulf %116, %119 : vector<8x128xf32>
    %cst_47 = arith.constant 0.000000e+00 : f32
    %121 = vector.broadcast %cst_47 : f32 to vector<8x128xf32>
    %122 = arith.cmpf oge, %120, %121 : vector<8x128xf32>
    %cst_48 = arith.constant 1.000000e+00 : f32
    %cst_49 = arith.constant -1.000000e+00 : f32
    %123 = vector.broadcast %cst_48 : f32 to vector<8x128xf32>
    %124 = vector.broadcast %cst_49 : f32 to vector<8x128xf32>
    %125 = arith.select %122, %123, %124 : vector<8x128xi1>, vector<8x128xf32>
    %126 = math.absf %120 : vector<8x128xf32>
    %cst_50 = arith.constant 0.327591091 : f32
    %127 = vector.broadcast %cst_50 : f32 to vector<8x128xf32>
    %128 = arith.mulf %127, %126 : vector<8x128xf32>
    %cst_51 = arith.constant 1.000000e+00 : f32
    %129 = vector.broadcast %cst_51 : f32 to vector<8x128xf32>
    %130 = arith.addf %129, %128 : vector<8x128xf32>
    %cst_52 = arith.constant 1.000000e+00 : f32
    %131 = vector.broadcast %cst_52 : f32 to vector<8x128xf32>
    %132 = arith.divf %131, %130 : vector<8x128xf32>
    %cst_53 = arith.constant 1.06140542 : f32
    %133 = vector.broadcast %cst_53 : f32 to vector<8x128xf32>
    %134 = arith.mulf %133, %132 : vector<8x128xf32>
    %cst_54 = arith.constant -1.45315206 : f32
    %135 = vector.broadcast %cst_54 : f32 to vector<8x128xf32>
    %136 = arith.addf %134, %135 : vector<8x128xf32>
    %137 = arith.mulf %136, %132 : vector<8x128xf32>
    %cst_55 = arith.constant 1.42141378 : f32
    %138 = vector.broadcast %cst_55 : f32 to vector<8x128xf32>
    %139 = arith.addf %137, %138 : vector<8x128xf32>
    %140 = arith.mulf %139, %132 : vector<8x128xf32>
    %cst_56 = arith.constant -0.284496725 : f32
    %141 = vector.broadcast %cst_56 : f32 to vector<8x128xf32>
    %142 = arith.addf %140, %141 : vector<8x128xf32>
    %143 = arith.mulf %142, %132 : vector<8x128xf32>
    %cst_57 = arith.constant 0.254829586 : f32
    %144 = vector.broadcast %cst_57 : f32 to vector<8x128xf32>
    %145 = arith.addf %143, %144 : vector<8x128xf32>
    %146 = arith.mulf %145, %132 : vector<8x128xf32>
    %cst_58 = arith.constant 0.000000e+00 : f32
    %147 = vector.broadcast %cst_58 : f32 to vector<8x128xf32>
    %148 = arith.subf %147, %126 : vector<8x128xf32>
    %149 = arith.mulf %148, %126 : vector<8x128xf32>
    %150 = math.exp %149 : vector<8x128xf32>
    %151 = arith.mulf %146, %150 : vector<8x128xf32>
    %cst_59 = arith.constant 1.000000e+00 : f32
    %152 = vector.broadcast %cst_59 : f32 to vector<8x128xf32>
    %153 = arith.subf %152, %151 : vector<8x128xf32>
    %154 = arith.mulf %125, %153 : vector<8x128xf32>
    %cst_60 = arith.constant 1.000000e+00 : f32
    %155 = vector.broadcast %cst_60 : f32 to vector<8x128xf32>
    %156 = arith.addf %155, %154 : vector<8x128xf32>
    %157 = arith.mulf %118, %156 : vector<8x128xf32>
    %158 = arith.truncf %157 : vector<8x128xf32> to vector<8x128xbf16>
    %c0_61 = arith.constant 0 : index
    %c0_62 = arith.constant 0 : index
    %159 = vector.load %arg9[%c0_61, %c0_62] : memref<128x32xbf16, #tpu.memory_space<vmem>>, vector<128x32xbf16>
    %cst_63 = arith.constant dense<0.000000e+00> : vector<8x32xf32>
    %160 = tpu.matmul %158, %159, %cst_63 {dimension_numbers = #tpu.dot_dimension_numbers<[1], [0], [0], [1], [0, 0, 1, 1], [], []>} : vector<8x128xbf16>, vector<128x32xbf16>, vector<8x32xf32> -> vector<8x32xf32>
    %c0_64 = arith.constant 0 : index
    %c0_65 = arith.constant 0 : index
    %161 = vector.load %arg10[%c0_64, %c0_65] : memref<1x32xf32, #tpu.memory_space<vmem>>, vector<1x32xf32>
    %162 = vector.broadcast %161 : vector<1x32xf32> to vector<8x32xf32>
    %163 = arith.addf %160, %162 : vector<8x32xf32>
    %c0_66 = arith.constant 0 : index
    %c0_67 = arith.constant 0 : index
    %164 = vector.load %arg11[%c0_66, %c0_67] : memref<1x32xf32, #tpu.memory_space<vmem>>, vector<1x32xf32>
    %c0_68 = arith.constant 0 : index
    %c0_69 = arith.constant 0 : index
    %165 = vector.load %arg12[%c0_68, %c0_69] : memref<1x32xf32, #tpu.memory_space<vmem>>, vector<1x32xf32>
    %cst_70 = arith.constant dense<0.000000e+00> : vector<8xf32>
    %166 = vector.multi_reduction <add>, %163, %cst_70 [1] : vector<8x32xf32> to vector<8xf32>
    %167 = vector.shape_cast %166 : vector<8xf32> to vector<8x1xf32>
    %cst_71 = arith.constant 3.200000e+01 : f32
    %168 = vector.broadcast %cst_71 : f32 to vector<8x1xf32>
    %169 = arith.divf %167, %168 : vector<8x1xf32>
    %170 = vector.broadcast %169 : vector<8x1xf32> to vector<8x32xf32>
    %171 = arith.subf %163, %170 : vector<8x32xf32>
    %172 = arith.mulf %171, %171 : vector<8x32xf32>
    %cst_72 = arith.constant dense<0.000000e+00> : vector<8xf32>
    %173 = vector.multi_reduction <add>, %172, %cst_72 [1] : vector<8x32xf32> to vector<8xf32>
    %174 = vector.shape_cast %173 : vector<8xf32> to vector<8x1xf32>
    %cst_73 = arith.constant 3.200000e+01 : f32
    %175 = vector.broadcast %cst_73 : f32 to vector<8x1xf32>
    %176 = arith.divf %174, %175 : vector<8x1xf32>
    %cst_74 = arith.constant 9.99999974E-6 : f32
    %177 = vector.broadcast %cst_74 : f32 to vector<8x1xf32>
    %178 = arith.addf %176, %177 : vector<8x1xf32>
    %179 = math.rsqrt %178 : vector<8x1xf32>
    %180 = vector.broadcast %179 : vector<8x1xf32> to vector<8x32xf32>
    %181 = arith.mulf %171, %180 : vector<8x32xf32>
    %182 = vector.broadcast %164 : vector<1x32xf32> to vector<8x32xf32>
    %183 = arith.mulf %181, %182 : vector<8x32xf32>
    %184 = vector.broadcast %165 : vector<1x32xf32> to vector<8x32xf32>
    %185 = arith.addf %183, %184 : vector<8x32xf32>
    %186 = arith.addf %110, %185 : vector<8x32xf32>
    %c0_75 = arith.constant 0 : index
    %c0_76 = arith.constant 0 : index
    %c0_77 = arith.constant 0 : index
    %187 = vector.load %arg13[%c0_75, %c0_76, %c0_77] : memref<1x8x32xf32, #tpu.memory_space<vmem>>, vector<1x8x32xf32>
    %188 = vector.shape_cast %187 : vector<1x8x32xf32> to vector<8x32xf32>
    %189 = vector.shape_cast %186 : vector<8x32xf32> to vector<1x8x32xf32>
    tpu.vector_store %arg13[%c0_75, %c0_76, %c0_77], %189 {strides = array<i32>} : memref<1x8x32xf32, #tpu.memory_space<vmem>>, vector<1x8x32xf32>,
    return
  }
  func.func @transform_0(%arg0: i32) -> (i32, i32, i32) {
    %c0_i32 = arith.constant 0 : i32
    %c0_i32_0 = arith.constant 0 : i32
    %c0_i32_1 = arith.constant 0 : i32
    return %arg0, %c0_i32, %c0_i32_0 : i32, i32, i32
  }
  func.func @transform_1(%arg0: i32) -> (i32, i32) {
    %c0_i32 = arith.constant 0 : i32
    %c0_i32_0 = arith.constant 0 : i32
    %c0_i32_1 = arith.constant 0 : i32
    return %c0_i32, %c0_i32_0 : i32, i32
  }
  func.func @transform_2(%arg0: i32) -> (i32, i32) {
    %c0_i32 = arith.constant 0 : i32
    %c0_i32_0 = arith.constant 0 : i32
    %c0_i32_1 = arith.constant 0 : i32
    return %c0_i32, %c0_i32_0 : i32, i32
  }
  func.func @transform_3(%arg0: i32) -> (i32, i32) {
    %c0_i32 = arith.constant 0 : i32
    %c0_i32_0 = arith.constant 0 : i32
    %c0_i32_1 = arith.constant 0 : i32
    return %c0_i32, %c0_i32_0 : i32, i32
  }
  func.func @transform_4(%arg0: i32) -> (i32, i32) {
    %c0_i32 = arith.constant 0 : i32
    %c0_i32_0 = arith.constant 0 : i32
    %c0_i32_1 = arith.constant 0 : i32
    return %c0_i32, %c0_i32_0 : i32, i32
  }
  func.func @transform_5(%arg0: i32) -> (i32, i32) {
    %c0_i32 = arith.constant 0 : i32
    %c0_i32_0 = arith.constant 0 : i32
    %c0_i32_1 = arith.constant 0 : i32
    return %c0_i32, %c0_i32_0 : i32, i32
  }
  func.func @transform_6(%arg0: i32) -> (i32, i32) {
    %c0_i32 = arith.constant 0 : i32
    %c0_i32_0 = arith.constant 0 : i32
    %c0_i32_1 = arith.constant 0 : i32
    return %c0_i32, %c0_i32_0 : i32, i32
  }
  func.func @transform_7(%arg0: i32) -> (i32, i32) {
    %c0_i32 = arith.constant 0 : i32
    %c0_i32_0 = arith.constant 0 : i32
    %c0_i32_1 = arith.constant 0 : i32
    return %c0_i32, %c0_i32_0 : i32, i32
  }
  func.func @transform_8(%arg0: i32) -> (i32, i32) {
    %c0_i32 = arith.constant 0 : i32
    %c0_i32_0 = arith.constant 0 : i32
    %c0_i32_1 = arith.constant 0 : i32
    return %c0_i32, %c0_i32_0 : i32, i32
  }
  func.func @transform_9(%arg0: i32) -> (i32, i32) {
    %c0_i32 = arith.constant 0 : i32
    %c0_i32_0 = arith.constant 0 : i32
    %c0_i32_1 = arith.constant 0 : i32
    return %c0_i32, %c0_i32_0 : i32, i32
  }
  func.func @transform_10(%arg0: i32) -> (i32, i32) {
    %c0_i32 = arith.constant 0 : i32
    %c0_i32_0 = arith.constant 0 : i32
    %c0_i32_1 = arith.constant 0 : i32
    return %c0_i32, %c0_i32_0 : i32, i32
  }
  func.func @transform_11(%arg0: i32) -> (i32, i32) {
    %c0_i32 = arith.constant 0 : i32
    %c0_i32_0 = arith.constant 0 : i32
    %c0_i32_1 = arith.constant 0 : i32
    return %c0_i32, %c0_i32_0 : i32, i32
  }
  func.func @transform_12(%arg0: i32) -> (i32, i32, i32) {
    %c0_i32 = arith.constant 0 : i32
    %c0_i32_0 = arith.constant 0 : i32
    %c0_i32_1 = arith.constant 0 : i32
    return %arg0, %c0_i32, %c0_i32_0 : i32, i32, i32
  }
}

</mosaic_0001>

<bundles_post_ra>
// kernel: tpu_custom_call.1
= control target key start
LH: loop header
LB: loop body
LE: loop exit
PB: predicated region body
PF: predicated region fallthrough
CT: control target
= control target key end

     0   :  { %s2169_s0 = inlined_call_operand.vmem [shape: f32[2,8,32], index: 0, kind: input, shape index: {}]   ;;  %s2170_s1 = inlined_call_operand.vmem [shape: bf16[32,96], index: 1, kind: input, shape index: {}]   ;;  %s2171_s2 = inlined_call_operand.vmem [shape: bf16[32,32], index: 2, kind: input, shape index: {}]   ;;  %s2172_s3 = inlined_call_operand.vmem [shape: f32[1,32], index: 3, kind: input, shape index: {}]   ;;  %s2173_s4 = inlined_call_operand.vmem [shape: f32[1,32], index: 4, kind: input, shape index: {}]   ;;  %s2174_s5 = inlined_call_operand.vmem [shape: f32[1,32], index: 5, kind: input, shape index: {}]   ;;  %s2175_s6 = inlined_call_operand.vmem [shape: bf16[32,128], index: 6, kind: input, shape index: {}]   ;;  %s2176_s7 = inlined_call_operand.vmem [shape: f32[1,128], index: 7, kind: input, shape index: {}]   ;;  %s2177_s8 = inlined_call_operand.vmem [shape: bf16[128,32], index: 8, kind: input, shape index: {}]   ;;  %s2178_s9 = inlined_call_operand.vmem [shape: f32[1,32], index: 9, kind: input, shape index: {}]   ;;  %s2179_s10 = inlined_call_operand.vmem [shape: f32[1,32], index: 10, kind: input, shape index: {}]   ;;  %s2180_s11 = inlined_call_operand.vmem [shape: f32[1,32], index: 11, kind: input, shape index: {}]   ;;  %s2181_s12 = inlined_call_operand.hbm [shape: f32[2,8,32], index: 12, kind: output, shape index: {}]  }
   0x1   :  { %2182 = sst [smem:[#allocation5_spill]] %s2169_s0 }
   0x2   :  { %2183 = sst [smem:[#allocation6_spill]] %s2170_s1 }
   0x3   :  { %2184 = sst [smem:[#allocation7_spill]] %s2171_s2 }
   0x4   :  { %17 = vsyncpa [#allocation3], 0 }
   0x5   :  { %19 = vsyncpa [#allocation3 + $0x1], 0  ;;  %s1880_s21 = smov 0   ;;  %s1882_s22 = smov 0  }
   0x6   :  { %s1884_s23 = smov 0   ;;  %s1886_s24 = smov 0  }
   0x7 LB: > { %s1901_s25 = sadd.s32 4294967295, %s1798_s24   ;;  %s1457_s26 = sadd.s32 4294967294, %s1798_s24   ;;  %s1798_s24 = sphi %s1886_s24, %s2193_s24   ;;  %s1794_s23 = sphi %s1884_s23, %s2192_s23   ;;  %s1790_s22 = sphi %s1882_s22, %s2191_s22   ;;  %s1786_s21 = sphi %s1880_s21, %s2190_s21  }
   0x8   : > { %s1905_s27 = sadd.s32 1, %s1798_s24   ;;  %s289_s28 = sadd.s32 1, %s1794_s23 }
   0x9   : > { %s286_s29 = ssub.s32 %s1798_s24, %s1905_s27  ;;  %p299_p0 = scmp.ne.s32.totalorder %s1794_s23, %s1790_s22 }
   0xa   : > { %p287_p1 = scmp.eq.s32.totalorder %s286_s29, 0  ;;  %p300_p2 = scmp.eq.s32.totalorder %s1901_s25, 1 }
   0xb   : > { %p305_p3 = scmp.ne.s32.totalorder %s1790_s22, %s1786_s21  ;;  %p306_p4 = scmp.eq.s32.totalorder %s1457_s26, 1 }
   0xc   : > { %s1916_s30 = scalar_select %p287_p1, %s1794_s23, %s289_s28  }
   0xd   : > { %p1918_p5 = por %p300_p2, %p299_p0  ;;  %p1922_p6 = por %p306_p4, %p305_p3 }
   0xe   : > { %p1460_p7 = scmp.ge.s32.totalorder %s1798_s24, 1  ;;  %p364_p8 = scmp.lt.s32.totalorder %s1798_s24, 3 }
  0x10   : > { %p365_p9 = pnand %p1460_p7, %p364_p8 }
  0x11   : > { %s2187_s1 = sld [smem:[#allocation6_spill]] (!%p365_p9)  ;;  %v1800_v1 = vmov (!%p365_p9), 0.0   ;;  %vm1801_vm0 = vmmov (!%p365_p9), 0   ;;  %p405_p10 = scmp.lt.s32.totalorder (!%p365_p9), %s1901_s25, 1  ;;  %vm428_vm1 = vcmask (!%p365_p9), 261120   ;;  %vm476_vm2 = vcmask (!%p365_p9), 64512  }
  0x12   : > { %368 = sbr.rel (%p365_p9) target bundleno = 4272 (0x10b0), region = 68  ;;  %1539 = vmatprep.subr.bf16.mxu1 (!%p365_p9), %v1800_v1  ;;  %1565 = vmatprep.subr.bf16.mxu0 (!%p365_p9), %v1800_v1  ;;  %s2188_s0 = sld [smem:[#allocation5_spill]] (!%p365_p9)  ;;  %vm540_vm3 = vcmask (!%p365_p9), 1043456  }
  0x13   : > { %1543 = vmatprep.mubr.msk.bf16.mxu1 (!%p365_p9), %vm1801_vm0, %v1800_v1  ;;  %1567 = vmatprep.mubr.msk.bf16.mxu0 (!%p365_p9), %vm1801_vm0, %v1800_v1  ;;  %s1802_s15 = smov (!%p365_p9), 64   ;;  %s1803_s16 = smov (!%p365_p9), 96  }
  0x14   : > { %s1804_s17 = smov (!%p365_p9), 88   ;;  %s1805_s18 = smov (!%p365_p9), 120  }
  0x15   : > { %s1808_s26 = smov (!%p365_p9), 112   ;;  %s2189_s2 = sld [smem:[#allocation7_spill]] (!%p365_p9) }
  0x16   : > { %s1812_s28 = smov (!%p365_p9), 40  }
  0x17   : > { %v1700_v0 = vld [vmem:[%s2187_s1] sm:$0xff] (!%p365_p9)   ;;  %v1701_v2 = vld [vmem:[%s2187_s1 + $0x8] sm:$0xff] (!%p365_p9)  }
  0x18   : > { %1540 = vmatpush3.bf16.msra.mxu1 (!%p365_p9), %v1700_v0 }
  0x19   : > { %1541 = vmatprep.subr.bf16.mxu1 %v1800_v1  ;;  %s406_s19 = scalar_select %p405_p10, %s1901_s25, 1 }
  0x1b   : > { %s1462_s20 = sshll.u32 %s406_s19, 3  ;;  %s1806_s19 = smov 56   ;;  %v697_v45 = vld [vmem:[%s2189_s2 + $0x4] sm:$0xf]  ;;  %v585_v51 = vld [vmem:[%s2189_s2] sm:$0xf] }
  0x1c   : > { %1542 = vmatpush3.bf16.msra.mxu1 %v1701_v2  ;;  %s408_s29 = scalar_lea.vmem %s2188_s0, %s1462_s20  ;;  %s1807_s20 = smov 80   ;;  %v702_v46 = vsel %vm540_vm3, %v697_v45, 0  ;;  %v748_v54 = vsel %vm540_vm3, %v585_v51, 0 }
  0x1d   : > { %1547 = vmatprep.subr.bf16.mxu1 %v1800_v1  ;;  %v1947_v3 = vld [vmem:[%s408_s29] sm:$0xff] }
  0x1e   : > { %v411_v4 = vpack.c.bf16 %v1947_v3, %v1947_v3 }
  0x20   : > { %1544 = vmatmul.mubr.msk.bf16.vlgmr.msra.gmra.mrb[0].mxu1 %vm428_vm1, %v411_v4 }
  0x21   : > { %1549 = vmatprep.mubr.msk.bf16.mxu1 %vm1801_vm0, %v1800_v1 }
  0xf3   : > { %v466_v5 = vpop.f32.mrb[0].mxu1 }
  0xf4   : > { %v1954_v6 = vpack.c.bf16 %v466_v5, %v466_v5  ;;  %v1545_v7 = vpop.f32.mrb[1].mxu1 }
  0xf5   : > { %v469_v8 = vpop.f32.mrb[2].mxu1 }
  0xf6   : > { %535 = vrot.lane.b32.xlu1 %v1954_v6, %s1802_s15  ;;  %474 = vrot.lane.b32.xlu0 %v1954_v6, %s1803_s16  ;;  %v1546_v9 = vpop.f32.mrb[3].mxu1  ;;  %s1497_s16 = sshll.u32 %s1901_s25, 7  ;;  %s1814_s25 = smov [#allocation2]  }
 0x168   : > { %v475_v10 = vpop.permute.xlu0 %474  ;;  %v536_v12 = vpop.permute.xlu1 %535 }
 0x169   : > { %v481_v11 = vsel %vm476_vm2, %v475_v10, 0  ;;  %v542_v13 = vsel %vm540_vm3, %v536_v12, 0 }
 0x16a   : > { %1548 = vmatpush3.bf16.xpose.msra.mxu1 %v481_v11 }
 0x16b   : > { %1553 = vmatprep.subr.bf16.mxu1 %v1800_v1 }
 0x171   : > { %1550 = vmatmul.mubr.msk.bf16.vlgmr.msra.gmra.mrb[4].mxu1 %vm476_vm2, %v1954_v6 }
 0x172   : > { %1554 = vmatpush3.bf16.msra.mxu1 %v542_v13  ;;  %1555 = vmatprep.mubr.msk.bf16.mxu1 %vm1801_vm0, %v1800_v1 }
 0x173   : > { %1559 = vmatprep.subr.bf16.mxu1 %v1800_v1 }
 0x244   : > { %v517_v14 = vpop.f32.mrb[4].mxu1 }
 0x245   : > { %v1551_v15 = vpop.f32.mrb[5].mxu1  ;;  %v523_v16 = vsel %vm476_vm2, %v517_v14, -inf }
 0x246   : > { %524 = vmax.xlane.f32.xlu0 %v523_v16  ;;  %v520_v17 = vpop.f32.mrb[6].mxu1 }
 0x247   : > { %v1552_v18 = vpop.f32.mrb[7].mxu1 }
 0x2d3   : > { %v525_v19 = vpop.xlane.xlu0 %524 }
 0x2d4   : > { %v526_v20 = vsub.f32 %v517_v14, %v525_v19 }
 0x2d6   : > { %v527_v21 = vmul.f32 1.442695, %v526_v20 }
 0x2d8   : > { %1712 = vpow2.f32 %v527_v21 }
 0x2e2   : > { %v1713_v22 = vpop.eup %1712 }
 0x2e3   : > { %v529_v23 = vsel %vm476_vm2, %v1713_v22, 0.0 }
 0x2e4   : > { %530 = vadd.xlane.f32.xlu1 %v529_v23 }
 0x2f5   : > { %588 = vrot.lane.b32.xlu1 %v1954_v6, %s1804_s17  ;;  %s1809_s17 = smov 48  }
 0x2f9   : > { %586 = vrot.lane.b32.xlu1 %v1954_v6, %s1805_s18  ;;  %s1810_s18 = smov 72  }
 0x371   : > { %v531_v24 = vpop.xlane.xlu1 %530 }
 0x372   : > { %1714 = vrcp.f32 %v531_v24 }
 0x375   : > { %v589_v27 = vpop.permute.xlu1 %588 }
 0x376   : > { %v594_v29 = vsel %vm476_vm2, %v589_v27, 0 }
 0x379   : > { %v587_v30 = vpop.permute.xlu1 %586 }
 0x37c   : > { %v1715_v25 = vpop.eup %1714 }
 0x37d   : > { %v533_v26 = vmul.f32 %v1715_v25, %v1713_v22 }
 0x37f   : > { %v534_v28 = vpack.c.bf16 %v533_v26, %v533_v26 }
 0x381   : > { %1556 = vmatmul.mubr.msk.bf16.vlgmr.msra.gmra.mrb[8].mxu1 %vm476_vm2, %v534_v28 }
 0x382   : > { %1560 = vmatpush3.bf16.xpose.msra.mxu1 %v594_v29  ;;  %1561 = vmatprep.mubr.msk.bf16.mxu1 %vm1801_vm0, %v1800_v1 }
 0x383   : > { %1571 = vmatprep.subr.bf16.mxu1 %v1800_v1 }
 0x389   : > { %1562 = vmatmul.mubr.msk.bf16.vlgmr.msra.gmra.mrb[12].mxu1 %vm476_vm2, %v587_v30 }
 0x38a   : > { %1573 = vmatprep.mubr.msk.bf16.mxu1 %vm1801_vm0, %v1800_v1  ;;  %1572 = vmatpush3.bf16.msra.mxu1 %v702_v46 }
 0x38b   : > { %1583 = vmatprep.subr.bf16.mxu1 %v1800_v1 }
 0x454   : > { %v578_v31 = vpop.f32.mrb[8].mxu1 }
 0x455   : > { %v1557_v32 = vpop.f32.mrb[9].mxu1  ;;  %v584_v55 = vpack.c.bf16 %v578_v31, %v578_v31  ;;  %v901_v31 = vld [vmem:[%s2189_s2 + $0x8] sm:$0xf] }
 0x456   : > { %v581_v33 = vpop.f32.mrb[10].mxu1  ;;  %v906_v32 = vsel %vm540_vm3, %v901_v31, 0  ;;  %v1705_v31 = vld [vmem:[%s2177_s8 + $0x8] sm:$0xff]  }
 0x457   : > { %v1558_v34 = vpop.f32.mrb[11].mxu1 }
 0x45c   : > { %v630_v35 = vpop.f32.mrb[12].mxu1 }
 0x45d   : > { %v1563_v36 = vpop.f32.mrb[13].mxu1  ;;  %v636_v37 = vsel %vm476_vm2, %v630_v35, -inf }
 0x45e   : > { %637 = vmax.xlane.f32.xlu1 %v636_v37  ;;  %v633_v38 = vpop.f32.mrb[14].mxu1 }
 0x45f   : > { %v1564_v39 = vpop.f32.mrb[15].mxu1 }
 0x4eb   : > { %v638_v40 = vpop.xlane.xlu1 %637 }
 0x4ec   : > { %v639_v41 = vsub.f32 %v630_v35, %v638_v40 }
 0x4ee   : > { %v640_v42 = vmul.f32 1.442695, %v639_v41 }
 0x4f0   : > { %1716 = vpow2.f32 %v640_v42 }
 0x4fa   : > { %v1717_v43 = vpop.eup %1716 }
 0x4fb   : > { %v642_v44 = vsel %vm476_vm2, %v1717_v43, 0.0 }
 0x4fc   : > { %643 = vadd.xlane.f32.xlu0 %v642_v44 }
 0x512   : > { %648 = vrot.lane.b32.xlu0 %v1954_v6, %s1806_s19  ;;  %s1811_s19 = smov 104  }
 0x516   : > { %792 = vrot.lane.b32.xlu0 %v1954_v6, %s1807_s20 }
 0x51a   : > { %790 = vrot.lane.b32.xlu0 %v1954_v6, %s1808_s26 }
 0x589   : > { %v644_v47 = vpop.xlane.xlu0 %643 }
 0x58a   : > { %1718 = vrcp.f32 %v644_v47 }
 0x58d   : > { %v649_v48 = vpop.permute.xlu0 %648 }
 0x58e   : > { %v654_v49 = vsel %vm540_vm3, %v649_v48, 0  ;;  %v1060_v48 = vld [vmem:[%s2189_s2 + $0xc] sm:$0xf]  ;;  %s2126_s2 = scalar_lea.hbm %s2181_s12, %s1497_s16 }
 0x58f   : > { %1566 = vmatpush3.bf16.msra.mxu0 %v654_v49  ;;  %v1065_v49 = vsel %vm540_vm3, %v1060_v48, 0 }
 0x590   : > { %1577 = vmatprep.subr.bf16.mxu0 %v1800_v1 }
 0x591   : > { %v793_v56 = vpop.permute.xlu0 %792 }
 0x592   : > { %v798_v61 = vsel %vm476_vm2, %v793_v56, 0 }
 0x594   : > { %v1719_v50 = vpop.eup %1718 }
 0x595   : > { %v646_v52 = vmul.f32 %v1719_v50, %v1717_v43  ;;  %v791_v2 = vpop.permute.xlu0 %790 }
 0x597   : > { %v647_v53 = vpack.c.bf16 %v646_v52, %v646_v52 }
 0x599   : > { %1568 = vmatmul.mubr.msk.bf16.vlgmr.msra.gmra.mrb[0].mxu0 %vm476_vm2, %v647_v53 }
 0x59a   : > { %1578 = vmatpush3.bf16.msra.mxu0 %v748_v54  ;;  %1579 = vmatprep.mubr.msk.bf16.mxu0 %vm1801_vm0, %v1800_v1 }
 0x59b   : > { %1589 = vmatprep.subr.bf16.mxu0 %v1800_v1 }
 0x5a1   : > { %1580 = vmatmul.mubr.msk.bf16.vlgmr.msra.gmra.mrb[4].mxu0 %vm476_vm2, %v584_v55 }
 0x5a2   : > { %1591 = vmatprep.mubr.msk.bf16.mxu0 %vm1801_vm0, %v1800_v1 }
 0x66c   : > { %v690_v57 = vpop.f32.mrb[0].mxu0 }
 0x66d   : > { %v696_v58 = vpack.c.bf16 %v690_v57, %v690_v57  ;;  %v1569_v59 = vpop.f32.mrb[1].mxu0 }
 0x66e   : > { %v693_v60 = vpop.f32.mrb[2].mxu0 }
 0x66f   : > { %v1570_v62 = vpop.f32.mrb[3].mxu0  ;;  %1574 = vmatmul.mubr.msk.bf16.vlgmr.msra.gmra.mrb[16].mxu1 %vm476_vm2, %v696_v58 }
 0x670   : > { %1584 = vmatpush3.bf16.xpose.msra.mxu1 %v798_v61  ;;  %1585 = vmatprep.mubr.msk.bf16.mxu1 %vm1801_vm0, %v1800_v1 }
 0x671   : > { %1595 = vmatprep.subr.bf16.mxu1 %v1800_v1 }
 0x674   : > { %v784_v63 = vpop.f32.mrb[4].mxu0 }
 0x675   : > { %v1581_v0 = vpop.f32.mrb[5].mxu0 }
 0x676   : > { %v787_v4 = vpop.f32.mrb[6].mxu0 }
 0x677   : > { %v1582_v5 = vpop.f32.mrb[7].mxu0  ;;  %1586 = vmatmul.mubr.msk.bf16.vlgmr.msra.gmra.mrb[20].mxu1 %vm476_vm2, %v791_v2  ;;  %v1478_v4 = vld [vmem:[%s2172_s3] ss:$0 sm:$0xff] }
 0x678   : > { %1597 = vmatprep.mubr.msk.bf16.mxu1 %vm1801_vm0, %v1800_v1  ;;  %1596 = vmatpush3.bf16.msra.mxu1 %v906_v32  ;;  %v1707_v32 = vld [vmem:[%s2177_s8 + $0x18] sm:$0xff]  }
 0x679   : > { %1607 = vmatprep.subr.bf16.mxu1 %v1800_v1 }
 0x742   : > { %v738_v7 = vpop.f32.mrb[16].mxu1 }
 0x743   : > { %v2009_v8 = vadd.f32 %v784_v63, %v738_v7  ;;  %v1575_v9 = vpop.f32.mrb[17].mxu1 }
 0x744   : > { %v741_v10 = vpop.f32.mrb[18].mxu1 }
 0x745   : > { %v1576_v11 = vpop.f32.mrb[19].mxu1 }
 0x74a   : > { %v834_v12 = vpop.f32.mrb[20].mxu1 }
 0x74b   : > { %v1587_v13 = vpop.f32.mrb[21].mxu1  ;;  %v840_v14 = vsel %vm476_vm2, %v834_v12, -inf }
 0x74c   : > { %841 = vmax.xlane.f32.xlu1 %v840_v14  ;;  %v837_v15 = vpop.f32.mrb[22].mxu1 }
 0x74d   : > { %v1588_v16 = vpop.f32.mrb[23].mxu1 }
 0x75d   : > { %852 = vrot.lane.b32.xlu1 %v1954_v6, %s1809_s17 }
 0x761   : > { %951 = vrot.lane.b32.xlu1 %v1954_v6, %s1810_s18 }
 0x765   : > { %949 = vrot.lane.b32.xlu1 %v1954_v6, %s1811_s19  ;;  %s402_s19 = sand.u32 1, %s1790_s22  }
 0x766   : > { %s1461_s20 = sshll.u32 %s402_s19, 3  ;;  %s1385_s26 = scalar_lea.sflag [#allocation3], %s402_s19 }
 0x767   : > { %s404_s17 = scalar_lea.vmem [#allocation2], %s1461_s20  ;;  %s1740_s20 = sshll.u32 %s1814_s25, 4  ;;  %s1741_s20 = int_to_ptr.vmem [resolvable:$false] %s1740_s20 }
 0x768   : > { %s1398_s18 = sshll.u32 %s404_s17, 4  ;;  %s1742_s29 = scalar_lea.vmem %s1741_s20, 256  ;;  %s2128_s18 = int_to_ptr.vmem [resolvable:$true] %s1398_s18 }
 0x769   : > { %p1743_p0 = scmp.lt.s32.totalorder %s2128_s18, %s1741_s20 }
 0x7d9   : > { %v842_v17 = vpop.xlane.xlu1 %841 }
 0x7da   : > { %v843_v18 = vsub.f32 %v834_v12, %v842_v17  ;;  %v1702_v17 = vld [vmem:[%s2175_s6] sm:$0xff]  }
 0x7dc   : > { %v844_v19 = vmul.f32 1.442695, %v843_v18  ;;  %v1703_v18 = vld [vmem:[%s2175_s6 + $0x8] sm:$0xff]  }
 0x7dd   : > { %v853_v20 = vpop.permute.xlu1 %852 }
 0x7de   : > { %1720 = vpow2.f32 %v844_v19  ;;  %v858_v21 = vsel %vm540_vm3, %v853_v20, 0 }
 0x7df   : > { %1590 = vmatpush3.bf16.msra.mxu0 %v858_v21 }
 0x7e0   : > { %1601 = vmatprep.subr.bf16.mxu0 %v1800_v1 }
 0x7e1   : > { %v952_v27 = vpop.permute.xlu1 %951 }
 0x7e2   : > { %v957_v29 = vsel %vm476_vm2, %v952_v27, 0 }
 0x7e5   : > { %v950_v30 = vpop.permute.xlu1 %949 }
 0x7e8   : > { %v1721_v22 = vpop.eup %1720 }
 0x7e9   : > { %v846_v23 = vsel %vm476_vm2, %v1721_v22, 0.0 }
 0x7ea   : > { %847 = vadd.xlane.f32.xlu0 %v846_v23  ;;  %v1479_v23 = vld [vmem:[%s2173_s4] ss:$0 sm:$0xff] }
 0x877   : > { %v848_v24 = vpop.xlane.xlu0 %847 }
 0x878   : > { %1722 = vrcp.f32 %v848_v24 }
 0x882   : > { %v1723_v25 = vpop.eup %1722 }
 0x883   : > { %v850_v26 = vmul.f32 %v1723_v25, %v1721_v22  ;;  %v1480_v25 = vld [vmem:[%s2174_s5] ss:$0 sm:$0xff] }
 0x885   : > { %v851_v28 = vpack.c.bf16 %v850_v26, %v850_v26 }
 0x887   : > { %1592 = vmatmul.mubr.msk.bf16.vlgmr.msra.gmra.mrb[8].mxu0 %vm476_vm2, %v851_v28 }
 0x888   : > { %1602 = vmatpush3.bf16.xpose.msra.mxu0 %v957_v29  ;;  %1603 = vmatprep.mubr.msk.bf16.mxu0 %vm1801_vm0, %v1800_v1 }
 0x889   : > { %1613 = vmatprep.subr.bf16.mxu0 %v1800_v1 }
 0x88f   : > { %1604 = vmatmul.mubr.msk.bf16.vlgmr.msra.gmra.mrb[12].mxu0 %vm476_vm2, %v950_v30  ;;  %v1704_v30 = vld [vmem:[%s2177_s8] sm:$0xff]  }
 0x890   : > { %1615 = vmatprep.mubr.msk.bf16.mxu0 %vm1801_vm0, %v1800_v1  ;;  %1614 = vmatpush3.bf16.msra.mxu0 %v1065_v49 }
 0x891   : > { %1627 = vmatprep.subr.bf16.mxu0 %v1800_v1 }
 0x95a   : > { %v894_v33 = vpop.f32.mrb[8].mxu0 }
 0x95b   : > { %v900_v34 = vpack.c.bf16 %v894_v33, %v894_v33  ;;  %v1593_v35 = vpop.f32.mrb[9].mxu0  ;;  %v1708_v33 = vld [vmem:[%s2177_s8 + $0x20] sm:$0xff]  }
 0x95c   : > { %v897_v36 = vpop.f32.mrb[10].mxu0  ;;  %v1710_v35 = vld [vmem:[%s2177_s8 + $0x30] sm:$0xff]  }
 0x95d   : > { %v1594_v37 = vpop.f32.mrb[11].mxu0  ;;  %1598 = vmatmul.mubr.msk.bf16.vlgmr.msra.gmra.mrb[24].mxu1 %vm476_vm2, %v900_v34  ;;  %v1709_v34 = vld [vmem:[%s2177_s8 + $0x28] sm:$0xff]   ;;  %v1711_v36 = vld [vmem:[%s2177_s8 + $0x38] sm:$0xff]  }
 0x95e   : > { %1609 = vmatprep.mubr.msk.bf16.mxu1 %vm1801_vm0, %v1800_v1  ;;  %v1481_v37 = vld [vmem:[%s2176_s7] ss:$0 sm:$0xff] }
 0x962   : > { %v993_v38 = vpop.f32.mrb[12].mxu0 }
 0x963   : > { %v1605_v39 = vpop.f32.mrb[13].mxu0  ;;  %v999_v40 = vsel %vm476_vm2, %v993_v38, -inf }
 0x964   : > { %1000 = vmax.xlane.f32.xlu1 %v999_v40  ;;  %v996_v41 = vpop.f32.mrb[14].mxu0 }
 0x965   : > { %v1606_v42 = vpop.f32.mrb[15].mxu0 }
 0x9f1   : > { %v1001_v43 = vpop.xlane.xlu1 %1000 }
 0x9f2   : > { %v1002_v44 = vsub.f32 %v993_v38, %v1001_v43 }
 0x9f4   : > { %v1003_v45 = vmul.f32 1.442695, %v1002_v44 }
 0x9f6   : > { %1724 = vpow2.f32 %v1003_v45 }
 0xa00   : > { %v1725_v46 = vpop.eup %1724 }
 0xa01   : > { %v1005_v47 = vsel %vm476_vm2, %v1725_v46, 0.0 }
 0xa02   : > { %1006 = vadd.xlane.f32.xlu0 %v1005_v47 }
 0xa18   : > { %1011 = vrot.lane.b32.xlu0 %v1954_v6, %s1812_s28  ;;  %s1736_s28 = scalar_lea.vmem %s2128_s18, 128 }
 0xa19   : > { %p1737_p11 = scmp.ne.s32.totalorder %s2128_s18, %s1736_s28  ;;  %p1744_p1 = scmp.lt.s32.totalorder %s1742_s29, %s1736_s28 }
 0xa1b   : > { %p1738_p12 = pnand %p1737_p11, %p1918_p5  ;;  %p1745_p2 = por %p1744_p1, %p1743_p0 }
 0xa1d   : > { %p1739_p13 = pneg %p1738_p12 }
 0xa1f   : > { %p1746_p3 = pnand %p1745_p2, %p1739_p13 }
 0xa30   : > { %v942_v50 = vpop.f32.mrb[24].mxu1 }
 0xa31   : > { %v948_v51 = vadd.f32 %v942_v50, %v2009_v8  ;;  %v1599_v52 = vpop.f32.mrb[25].mxu1 }
 0xa32   : > { %v945_v53 = vpop.f32.mrb[26].mxu1 }
 0xa33   : > { %v1600_v54 = vpop.f32.mrb[27].mxu1 }
 0xa8f   : > { %v1007_v55 = vpop.xlane.xlu0 %1006 }
 0xa90   : > { %1726 = vrcp.f32 %v1007_v55 }
 0xa93   : > { %v1012_v56 = vpop.permute.xlu0 %1011 }
 0xa94   : > { %v1017_v6 = vsel %vm540_vm3, %v1012_v56, 0 }
 0xa95   : > { %1608 = vmatpush3.bf16.msra.mxu1 %v1017_v6 }
 0xa96   : > { %1619 = vmatprep.subr.bf16.mxu1 %v1800_v1 }
 0xa9a   : > { %v1727_v57 = vpop.eup %1726 }
 0xa9b   : > { %v1009_v58 = vmul.f32 %v1727_v57, %v1725_v46 }
 0xa9d   : > { %v1010_v59 = vpack.c.bf16 %v1009_v58, %v1009_v58 }
 0xa9f   : > { %1610 = vmatmul.mubr.msk.bf16.vlgmr.msra.gmra.mrb[28].mxu1 %vm476_vm2, %v1010_v59 }
 0xaa0   : > { %1623 = vmatprep.mubr.msk.bf16.mxu1 %vm1801_vm0, %v1800_v1  ;;  %1620 = vmatpush3.bf16.msra.mxu1 %v1702_v17 }
 0xaa1   : > { %1621 = vmatprep.subr.bf16.mxu1 %v1800_v1 }
 0xaa4   : > { %1622 = vmatpush3.bf16.msra.mxu1 %v1703_v18 }
 0xb72   : > { %v1053_v60 = vpop.f32.mrb[28].mxu1 }
 0xb73   : > { %v1059_v61 = vpack.c.bf16 %v1053_v60, %v1053_v60  ;;  %v1611_v62 = vpop.f32.mrb[29].mxu1 }
 0xb74   : > { %v1056_v63 = vpop.f32.mrb[30].mxu1 }
 0xb75   : > { %v1612_v0 = vpop.f32.mrb[31].mxu1  ;;  %1616 = vmatmul.mubr.msk.bf16.vlgmr.msra.gmra.mrb[16].mxu0 %vm476_vm2, %v1059_v61  ;;  %v1813_v61 = vmov -1.0  }
 0xb76   : > { %1643 = vmatprep.mubr.msk.bf16.mxu0 %vm1801_vm0, %v1800_v1  ;;  %1628 = vmatpush3.bf16.msra.mxu0 %v1704_v30 }
 0xb77   : > { %1629 = vmatprep.subr.bf16.mxu0 %v1800_v1 }
 0xb7a   : > { %1630 = vmatpush3.bf16.msra.mxu0 %v1705_v31 }
 0xb7b   : > { %1631 = vmatprep.subr.bf16.mxu0 %v1800_v1 }
 0xc48   : > { %v1101_v2 = vpop.f32.mrb[16].mxu0 }
 0xc49   : > { %v1107_v5 = vadd.f32 %v1101_v2, %v948_v51  ;;  %v1617_v7 = vpop.f32.mrb[17].mxu0 }
 0xc4a   : > { %v1104_v8 = vpop.f32.mrb[18].mxu0  ;;  %v1485_v7 = vld [vmem:[%s2178_s9] ss:$0 sm:$0xff] }
 0xc4b   : > { %v1618_v9 = vpop.f32.mrb[19].mxu0  ;;  %v1115_v10 = vadd.f32 %v1478_v4, %v1107_v5 }
 0xc4d   : > { %v1118_v11 = vsel %vm428_vm1, %v1115_v10, 0.0 }
 0xc4e   : > { %1119 = vadd.xlane.f32.xlu0 %v1118_v11 }
 0xcdb   : > { %v1120_v12 = vpop.xlane.xlu0 %1119 }
 0xcdc   : > { %v1122_v13 = vmul.f32 0.03125, %v1120_v12 }
 0xcde   : > { %v1123_v14 = vsub.f32 %v1115_v10, %v1122_v13 }
 0xce0   : > { %v1124_v15 = vmul.f32 %v1123_v14, %v1123_v14 }
 0xce2   : > { %v1125_v16 = vsel %vm428_vm1, %v1124_v15, 0.0 }
 0xce3   : > { %1126 = vadd.xlane.f32.xlu1 %v1125_v16 }
 0xd70   : > { %v1127_v19 = vpop.xlane.xlu1 %1126 }
 0xd71   : > { %v1128_v20 = vmul.f32 0.03125, %v1127_v19 }
 0xd73   : > { %v1129_v21 = vadd.f32 1e-05, %v1128_v20 }
 0xd75   : > { %1728 = vrsqrt.f32 %v1129_v21 }
 0xd7f   : > { %v1729_v22 = vpop.eup %1728 }
 0xd80   : > { %v1131_v24 = vmul.f32 %v1729_v22, %v1123_v14 }
 0xd82   : > { %v1138_v26 = vmul.f32 %v1479_v23, %v1131_v24  ;;  %v1494_v23 = vld [vmem:[%s2179_s10] ss:$0 sm:$0xff] }
 0xd84   : > { %v1145_v27 = vadd.f32 %v1480_v25, %v1138_v26  ;;  %v1495_v25 = vld [vmem:[%s2180_s11] ss:$0 sm:$0xff] }
 0xd86   : > { %v2070_v28 = vadd.f32 %v1145_v27, %v1947_v3  ;;  %v1706_v3 = vld [vmem:[%s2177_s8 + $0x10] sm:$0xff]  }
 0xd87   : > { %1632 = vmatpush3.bf16.msra.mxu0 %v1706_v3 }
 0xd88   : > { %v1147_v29 = vpack.c.bf16 %v2070_v28, %v2070_v28  ;;  %1633 = vmatprep.subr.bf16.mxu0 %v1800_v1 }
 0xd8a   : > { %1624 = vmatmul.mubr.msk.bf16.vlgmr.msra.gmra.mrb[32].mxu1 %vm428_vm1, %v1147_v29 }
 0xd8b   : > { %1634 = vmatpush3.bf16.msra.mxu0 %v1707_v32 }
 0xd8c   : > { %1635 = vmatprep.subr.bf16.mxu0 %v1800_v1 }
 0xd8f   : > { %1636 = vmatpush3.bf16.msra.mxu0 %v1708_v33 }
 0xd90   : > { %1637 = vmatprep.subr.bf16.mxu0 %v1800_v1 }
 0xd93   : > { %1638 = vmatpush3.bf16.msra.mxu0 %v1709_v34 }
 0xd94   : > { %1639 = vmatprep.subr.bf16.mxu0 %v1800_v1 }
 0xd97   : > { %1640 = vmatpush3.bf16.msra.mxu0 %v1710_v35 }
 0xd98   : > { %1641 = vmatprep.subr.bf16.mxu0 %v1800_v1 }
 0xd9b   : > { %1642 = vmatpush3.bf16.msra.mxu0 %v1711_v36 }
 0xe5d   : > { %v1208_v38 = vpop.f32.mrb[32].mxu1 }
 0xe5e   : > { %v1209_v39 = vadd.f32 %v1481_v37, %v1208_v38  ;;  %v1625_v40 = vpop.f32.mrb[33].mxu1 }
 0xe5f   : > { %v1211_v41 = vpop.f32.mrb[34].mxu1 }
 0xe60   : > { %v1215_v42 = vmul.f32 0.70710677, %v1209_v39  ;;  %v1626_v43 = vpop.f32.mrb[35].mxu1  ;;  %v1214_v0 = vmul.f32 0.5, %v1209_v39 }
 0xe62   : > { %v1218_v44 = vand.u32 2147483647, %v1215_v42  ;;  %vm1216_vm4 = vcmp.ge.f32.partialorder %v1215_v42, 0.0 }
 0xe63   : > { %v1217_v62 = vsel %vm1216_vm4, 1.0, %v1813_v61 }
 0xe64   : > { %v1219_v45 = vmul.f32 0.3275911, %v1218_v44  ;;  %v1232_v1 = vsub.f32 0.0, %v1218_v44 }
 0xe66   : > { %v1220_v46 = vadd.f32 1.0, %v1219_v45  ;;  %v1233_v48 = vmul.f32 %v1232_v1, %v1218_v44 }
 0xe68   : > { %1730 = vrcp.f32 %v1220_v46  ;;  %v1234_v51 = vmul.f32 1.442695, %v1233_v48 }
 0xe6a   : > { %1732 = vpow2.f32 %v1234_v51 }
 0xe72   : > { %v1731_v47 = vpop.eup %1730 }
 0xe73   : > { %v1223_v49 = vmul.f32 1.0614054, %v1731_v47 }
 0xe74   : > { %v1733_v58 = vpop.eup %1732 }
 0xe75   : > { %v1224_v50 = vadd.f32 -1.4531521, %v1223_v49 }
 0xe77   : > { %v1225_v52 = vmul.f32 %v1731_v47, %v1224_v50 }
 0xe79   : > { %v1226_v53 = vadd.f32 1.4214138, %v1225_v52 }
 0xe7b   : > { %v1227_v54 = vmul.f32 %v1731_v47, %v1226_v53 }
 0xe7d   : > { %v1228_v55 = vadd.f32 -0.28449672, %v1227_v54 }
 0xe7f   : > { %v1229_v56 = vmul.f32 %v1731_v47, %v1228_v55 }
 0xe81   : > { %v1230_v6 = vadd.f32 0.2548296, %v1229_v56 }
 0xe83   : > { %v1231_v57 = vmul.f32 %v1731_v47, %v1230_v6 }
 0xe85   : > { %v1236_v59 = vmul.f32 %v1733_v58, %v1231_v57 }
 0xe87   : > { %v1237_v60 = vsub.f32 1.0, %v1236_v59 }
 0xe89   : > { %v1238_v63 = vmul.f32 %v1237_v60, %v1217_v62 }
 0xe8b   : > { %v1239_v2 = vadd.f32 1.0, %v1238_v63 }
 0xe8d   : > { %v1240_v4 = vmul.f32 %v1239_v2, %v1214_v0 }
 0xe8f   : > { %v1241_v5 = vpack.c.bf16 %v1240_v4, %v1240_v4 }
 0xe91   : > { %1644 = vmatmul.mubr.bf16.vlgmr.msra.gmra.mrb[20].mxu0 %v1241_v5 }
 0xf64   : > { %v1347_v8 = vpop.f32.mrb[20].mxu0 }
 0xf65   : > { %v1348_v9 = vadd.f32 %v1485_v7, %v1347_v8  ;;  %v1645_v10 = vpop.f32.mrb[21].mxu0 }
 0xf66   : > { %v1350_v11 = vpop.f32.mrb[22].mxu0 }
 0xf67   : > { %v1646_v12 = vpop.f32.mrb[23].mxu0  ;;  %v1355_v13 = vsel %vm428_vm1, %v1348_v9, 0.0 }
 0xf68   : > { %1356 = vadd.xlane.f32.xlu1 %v1355_v13 }
 0xff5   : > { %v1357_v14 = vpop.xlane.xlu1 %1356 }
 0xff6   : > { %v1358_v15 = vmul.f32 0.03125, %v1357_v14 }
 0xff8   : > { %v1359_v16 = vsub.f32 %v1348_v9, %v1358_v15 }
 0xffa   : > { %v1360_v17 = vmul.f32 %v1359_v16, %v1359_v16 }
 0xffc   : > { %v1361_v18 = vsel %vm428_vm1, %v1360_v17, 0.0 }
 0xffd   : > { %1362 = vadd.xlane.f32.xlu1 %v1361_v18 }
0x108a   : > { %v1363_v19 = vpop.xlane.xlu1 %1362 }
0x108b   : > { %v1364_v20 = vmul.f32 0.03125, %v1363_v19 }
0x108d   : > { %v1365_v21 = vadd.f32 1e-05, %v1364_v20 }
0x108f   : > { %1734 = vrsqrt.f32 %v1365_v21 }
0x1099   : > { %v1735_v22 = vpop.eup %1734 }
0x109a   : > { %v1367_v24 = vmul.f32 %v1735_v22, %v1359_v16 }
0x109c   : > { %v1374_v26 = vmul.f32 %v1494_v23, %v1367_v24 }
0x109e   : > { %v1381_v27 = vadd.f32 %v1495_v25, %v1374_v26 }
0x10a0   : > { %v1382_v29 = vadd.f32 %v1381_v27, %v2070_v28 }
0x10a2   : > { %1383 = vst.msk [vmem:[%s404_s17] sm:$0xff] %vm428_vm1, %v1382_v29 }
0x10a3   : > { %1749 = shalt.err (!%p1746_p3)
}
0x10a4   : > { %s1750_s0 = scalar_lea.hbm %s2126_s2, 128  ;;  %s1754_s15 = scalar_lea.hbm %s2181_s12, 256 }
0x10a5   : > { %p1751_p4 = scmp.ne.s32.totalorder %s2126_s2, %s1750_s0  ;;  %p1755_p9 = scmp.lt.u32.totalorder %s2126_s2, %s2181_s12 }
0x10a6   : > { %p1756_p10 = scmp.lt.u32.totalorder %s1754_s15, %s1750_s0  ;;  %p1758_p12 = scmp.lt.u32.totalorder %s1750_s0, %s2126_s2 }
0x10a7   : > { %p1752_p7 = pnand %p1751_p4, %p1918_p5 }
0x10a8   : > { %p1757_p11 = por %p1756_p10, %p1755_p9 }
0x10a9   : > { %p1753_p8 = pneg %p1752_p7 }
0x10aa   : > { %p1759_p13 = por %p1758_p12, %p1757_p11 }
0x10ac   : > { %p1760_p0 = pnand %p1759_p13, %p1753_p8 }
0x10ae   : > { %1763 = shalt.err (!%p1760_p0)
}
0x10af   : > { %1647 = dma.vmem_to_hbm [thread:$0]  (%p1918_p5), %s2128_s18, 128, %s2126_s2, %s1385_s26  }
0x10b0 PF: > { %p1653_p1 = scmp.ge.s32.totalorder %s1798_s24, 2  ;;  %s1410_s28 = sand.u32 1, %s1786_s21  }
0x10b1   : > { %s1411_s25 = scalar_lea.sflag [#allocation3], %s1410_s28 }
0x10b2   : > { %p1650_p2 = pnand %p1653_p1, %p1922_p6 }
0x10b4   : > { %1781 = dma.done.wait (!%p1650_p2), %s1411_s25, 128  }
0x10b5   : > { %1783 = vsyncadd (!%p1650_p2), %s1411_s25, 4294967168  ;;  %p22_p3 = scmp.ge.s32.totalorder %s1905_s27, 4   ;;  %s2190_s21 = smov %s1790_s22 }
0x10b6   : > { %s2191_s22 = smov %s1794_s23  ;;  %s2192_s23 = smov %s1916_s30 }
0x10b7   : > { %s2193_s24 = smov %s1905_s27  ;;  %24 = sbr.rel (!%p22_p3) target bundleno = 7 (0x7), region = 103 }
0x10be   :  { %1416 = vsyncpa [#allocation3], 1 }
0x10bf   :  { %1418 = vsyncpa [#allocation3 + $0x1], 1 }

</bundles_post_ra>
